<compile_context>
chip_gen: v6e
topology: v6e:2x2x1
jax: 0.10.0
libtpu: 0.0.40
codegen_flags: <defaults>
</compile_context>

<pallas_src>
import functools

import jax
import jax.numpy as jnp
from jax import lax
from jax.experimental import pallas as pl
from jax.experimental.pallas import tpu as pltpu

BN_EPS = 1e-5


def _round_up(a, b):
    return ((a + b - 1) // b) * b


def _fold_bn(w, b, gamma, beta, mean, var):
    """Fold eval-mode BatchNorm1d into a preceding Linear layer (f32)."""
    scale = gamma * lax.rsqrt(var + BN_EPS)          # (C_out,)
    w_f = w * scale[None, :]                          # (C_in, C_out)
    b_f = (b - mean) * scale + beta                   # (C_out,)
    return w_f, b_f


def _linear_block_kernel(x_ref, w1_ref, w2_ref, bias_ref, o_ref):
    """x_ref: (TN, C_in)  w1_ref: (C_in, C_out)  w2_ref: (C_out, C_out)
    bias_ref: (2, C_out) f32 (row 0 = folded bias 1, row 1 = folded bias 2)
    o_ref: (TN, C_out) f32."""
    bias = bias_ref[...]
    b1 = bias[0:1, :]
    b2 = bias[1:2, :]

    # Layer 1: MXU matmul (f32 accumulation) + folded BN bias + ReLU (f32 VPU).
    h = jnp.dot(x_ref[...], w1_ref[...], preferred_element_type=jnp.float32)
    h = jnp.maximum(h + b1, 0.0)

    # Layer 2: cast activations back to the matmul dtype for the MXU.
    y = jnp.dot(h.astype(w2_ref.dtype), w2_ref[...],
                preferred_element_type=jnp.float32)
    y = jnp.maximum(y + b2, 0.0)
    o_ref[...] = y.astype(o_ref.dtype)


@functools.partial(jax.jit, static_argnames=("tile_n", "matmul_dtype"))
def linear_block_forward(x, params, tile_n=256, matmul_dtype="bfloat16"):
    """x: (N, C_in) float32.  params: dict of parameters (see init_params)."""
    N, c_in = x.shape
    c_out = params["w1"].shape[1]
    mm_dtype = jnp.dtype(matmul_dtype)

    # ---- Fold eval-mode BN into the two linear layers (f32, in the wrapper).
    w1f, b1f = _fold_bn(params["w1"], params["b1"], params["g1"],
                        params["be1"], params["m1"], params["v1"])
    w2f, b2f = _fold_bn(params["w2"], params["b2"], params["g2"],
                        params["be2"], params["m2"], params["v2"])

    # ---- Pad channels to 128-lane multiples, batch to the row-tile multiple.
    c_in_p = _round_up(c_in, 128)
    c_out_p = _round_up(c_out, 128)
    tn = max(8, min(tile_n, _round_up(N, 8)))   # don't over-tile tiny batches
    n_pad = _round_up(N, tn)

    x_p = jnp.zeros((n_pad, c_in_p), mm_dtype).at[:N, :c_in].set(
        x.astype(mm_dtype))
    w1_p = jnp.zeros((c_in_p, c_out_p), mm_dtype).at[:c_in, :c_out].set(
        w1f.astype(mm_dtype))
    w2_p = jnp.zeros((c_out_p, c_out_p), mm_dtype).at[:c_out, :c_out].set(
        w2f.astype(mm_dtype))
    bias = jnp.zeros((2, c_out_p), jnp.float32)
    bias = bias.at[0, :c_out].set(b1f).at[1, :c_out].set(b2f)

    # ---- Explicit VMEM budget (double-buffered tiles + resident weights),
    #      capped at 64 MiB so the config is valid on v7x as well.
    bpe = mm_dtype.itemsize
    vmem_est = (2 * tn * c_in_p * bpe          # x tiles (double buffered)
                + 2 * tn * c_out_p * 4         # out tiles (f32)
                + 2 * c_in_p * c_out_p * bpe   # W1
                + 2 * c_out_p * c_out_p * bpe  # W2
                + 2 * 8 * c_out_p * 4)         # packed bias (pads to 8 sublanes)
    vmem_limit = int(min(max(2 * vmem_est, 32 * 1024 * 1024), 64 * 1024 * 1024))

    out = pl.pallas_call(
        _linear_block_kernel,
        out_shape=jax.ShapeDtypeStruct((n_pad, c_out_p), jnp.float32),
        grid_spec=pltpu.PrefetchScalarGridSpec(
            num_scalar_prefetch=0,
            grid=(n_pad // tn,),
            in_specs=[
                pl.BlockSpec((tn, c_in_p), lambda i: (i, 0)),        # x tile
                pl.BlockSpec((c_in_p, c_out_p), lambda i: (0, 0)),   # W1 (folded)
                pl.BlockSpec((c_out_p, c_out_p), lambda i: (0, 0)),  # W2 (folded)
                pl.BlockSpec((2, c_out_p), lambda i: (0, 0)),        # packed biases
            ],
            out_specs=pl.BlockSpec((tn, c_out_p), lambda i: (i, 0)),
        ),
        compiler_params=pltpu.CompilerParams(
            dimension_semantics=("parallel",),   # row axis shards across TCs (v7x)
            vmem_limit_bytes=vmem_limit,
        ),
    )(x_p, w1_p, w2_p, bias)

    return out[:N, :c_out]


def init_params(key, ch_in, ch_out):
    """Deterministic init matching fresh-PyTorch shapes.
    Linear: U(-1/sqrt(fan_in), 1/sqrt(fan_in)); BN: gamma=1, beta=0,
    running_mean=0, running_var=1 (gamma/beta perturbed slightly so the BN
    affine is exercised)."""
    k1, k2, k3, k4, k5, k6 = jax.random.split(key, 6)
    bound1 = 1.0 / jnp.sqrt(ch_in)
    bound2 = 1.0 / jnp.sqrt(ch_out)
    return dict(
        # Linear 1: stored already transposed as (C_in, C_out)
        w1=jax.random.uniform(k1, (ch_in, ch_out), jnp.float32, -bound1, bound1),
        b1=jax.random.uniform(k2, (ch_out,), jnp.float32, -bound1, bound1),
        # BN 1
        g1=1.0 + 0.1 * jax.random.normal(k5, (ch_out,), jnp.float32),
        be1=0.1 * jax.random.normal(k6, (ch_out,), jnp.float32),
        m1=jnp.zeros((ch_out,), jnp.float32),
        v1=jnp.ones((ch_out,), jnp.float32),
        # Linear 2: (C_out, C_out)
        w2=jax.random.uniform(k3, (ch_out, ch_out), jnp.float32, -bound2, bound2),
        b2=jax.random.uniform(k4, (ch_out,), jnp.float32, -bound2, bound2),
        # BN 2
        g2=jnp.ones((ch_out,), jnp.float32),
        be2=jnp.zeros((ch_out,), jnp.float32),
        m2=jnp.zeros((ch_out,), jnp.float32),
        v2=jnp.ones((ch_out,), jnp.float32),
    )


def reference_forward(x, p):
    """Pure-JAX f32 reference of the original module (eval-mode BN, unfused)."""
    h = x @ p["w1"] + p["b1"]
    h = (h - p["m1"]) / jnp.sqrt(p["v1"] + BN_EPS) * p["g1"] + p["be1"]
    h = jnp.maximum(h, 0.0)
    y = h @ p["w2"] + p["b2"]
    y = (y - p["m2"]) / jnp.sqrt(p["v2"] + BN_EPS) * p["g2"] + p["be2"]
    return jnp.maximum(y, 0.0)


def matched_reference(x, p, matmul_dtype):
    """Reference with the same folding + matmul dtype as the kernel."""
    dt = jnp.dtype(matmul_dtype)
    w1f, b1f = _fold_bn(p["w1"], p["b1"], p["g1"], p["be1"], p["m1"], p["v1"])
    w2f, b2f = _fold_bn(p["w2"], p["b2"], p["g2"], p["be2"], p["m2"], p["v2"])
    h = jnp.dot(x.astype(dt), w1f.astype(dt),
                preferred_element_type=jnp.float32) + b1f
    h = jnp.maximum(h, 0.0)
    y = jnp.dot(h.astype(dt), w2f.astype(dt),
                preferred_element_type=jnp.float32) + b2f
    return jnp.maximum(y, 0.0)


if __name__ == "__main__":
    key = jax.random.PRNGKey(0)
    kx, kp = jax.random.split(key)

    batch, ch_in, ch_out = 8, 32, 64
    x = jax.random.normal(kx, (batch, ch_in), jnp.float32)
    params = init_params(kp, ch_in, ch_out)

    out = linear_block_forward(x, params)
    out = jax.block_until_ready(out)
    assert out.shape == (batch, ch_out)

    # Same-precision reference (folded BN, bf16 matmul operands, f32 accum).
    ref_m = matched_reference(x, params, "bfloat16")
    assert jnp.allclose(out, ref_m, atol=1e-4, rtol=1e-4), "mismatch vs matched ref"

    # Original-module f32 reference; tolerance accounts for bf16 matmul inputs.
    ref_f32 = reference_forward(x, params)
    assert jnp.allclose(out, ref_f32, atol=5e-2, rtol=5e-2), "mismatch vs f32 ref"

    print("KERNEL_OK")
</pallas_src>

<mosaic_0001>
module attributes {stable_mosaic.version = 11 : i64} {
  func.func @_linear_block_kernel(%arg0: i32, %arg1: memref<8x128xbf16, #tpu.memory_space<vmem>>, %arg2: memref<128x128xbf16, #tpu.memory_space<vmem>>, %arg3: memref<128x128xbf16, #tpu.memory_space<vmem>>, %arg4: memref<2x128xf32, #tpu.memory_space<vmem>>, %arg5: memref<8x128xf32, #tpu.memory_space<vmem>>) attributes {dimension_semantics = [#tpu.dimension_semantics<parallel>], iteration_bounds = array<i64: 1>, scalar_prefetch = 0 : i64, scratch_operands = 0 : i64, tpu.core_type = #tpu.core_type<tc>, window_params = [{transform_indices = @transform_0, window_bounds = array<i64: 8, 128>}, {pipeline_mode = #tpu.pipeline_mode<synchronous>, transform_indices = @transform_1, window_bounds = array<i64: 128, 128>}, {pipeline_mode = #tpu.pipeline_mode<synchronous>, transform_indices = @transform_2, window_bounds = array<i64: 128, 128>}, {pipeline_mode = #tpu.pipeline_mode<synchronous>, transform_indices = @transform_3, window_bounds = array<i64: 2, 128>}, {transform_indices = @transform_4, window_bounds = array<i64: 8, 128>}]} {
    %c0 = arith.constant 0 : index
    %c0_0 = arith.constant 0 : index
    %0 = vector.load %arg4[%c0, %c0_0] : memref<2x128xf32, #tpu.memory_space<vmem>>, vector<2x128xf32>
    %1 = vector.extract_strided_slice %0 {offsets = [0, 0], sizes = [1, 128], strides = [1, 1]} : vector<2x128xf32> to vector<1x128xf32>
    %2 = vector.extract_strided_slice %0 {offsets = [1, 0], sizes = [1, 128], strides = [1, 1]} : vector<2x128xf32> to vector<1x128xf32>
    %c0_1 = arith.constant 0 : index
    %c0_2 = arith.constant 0 : index
    %3 = vector.load %arg1[%c0_1, %c0_2] : memref<8x128xbf16, #tpu.memory_space<vmem>>, vector<8x128xbf16>
    %c0_3 = arith.constant 0 : index
    %c0_4 = arith.constant 0 : index
    %4 = vector.load %arg2[%c0_3, %c0_4] : memref<128x128xbf16, #tpu.memory_space<vmem>>, vector<128x128xbf16>
    %cst = arith.constant dense<0.000000e+00> : vector<8x128xf32>
    %5 = tpu.matmul %3, %4, %cst {dimension_numbers = #tpu.dot_dimension_numbers<[1], [0], [0], [1], [0, 0, 1, 1], [], []>} : vector<8x128xbf16>, vector<128x128xbf16>, vector<8x128xf32> -> vector<8x128xf32>
    %6 = vector.broadcast %1 : vector<1x128xf32> to vector<8x128xf32>
    %7 = arith.addf %5, %6 : vector<8x128xf32>
    %cst_5 = arith.constant 0.000000e+00 : f32
    %8 = vector.broadcast %cst_5 : f32 to vector<8x128xf32>
    %9 = arith.maximumf %7, %8 : vector<8x128xf32>
    %10 = arith.truncf %9 : vector<8x128xf32> to vector<8x128xbf16>
    %c0_6 = arith.constant 0 : index
    %c0_7 = arith.constant 0 : index
    %11 = vector.load %arg3[%c0_6, %c0_7] : memref<128x128xbf16, #tpu.memory_space<vmem>>, vector<128x128xbf16>
    %cst_8 = arith.constant dense<0.000000e+00> : vector<8x128xf32>
    %12 = tpu.matmul %10, %11, %cst_8 {dimension_numbers = #tpu.dot_dimension_numbers<[1], [0], [0], [1], [0, 0, 1, 1], [], []>} : vector<8x128xbf16>, vector<128x128xbf16>, vector<8x128xf32> -> vector<8x128xf32>
    %13 = vector.broadcast %2 : vector<1x128xf32> to vector<8x128xf32>
    %14 = arith.addf %12, %13 : vector<8x128xf32>
    %cst_9 = arith.constant 0.000000e+00 : f32
    %15 = vector.broadcast %cst_9 : f32 to vector<8x128xf32>
    %16 = arith.maximumf %14, %15 : vector<8x128xf32>
    %c0_10 = arith.constant 0 : index
    %c0_11 = arith.constant 0 : index
    %17 = vector.load %arg5[%c0_10, %c0_11] : memref<8x128xf32, #tpu.memory_space<vmem>>, vector<8x128xf32>
    tpu.vector_store %arg5[%c0_10, %c0_11], %16 {strides = array<i32>} : memref<8x128xf32, #tpu.memory_space<vmem>>, vector<8x128xf32>,
    return
  }
  func.func @transform_0(%arg0: i32) -> (i32, i32) {
    %c0_i32 = arith.constant 0 : i32
    %c0_i32_0 = arith.constant 0 : i32
    return %arg0, %c0_i32 : i32, i32
  }
  func.func @transform_1(%arg0: i32) -> (i32, i32) {
    %c0_i32 = arith.constant 0 : i32
    %c0_i32_0 = arith.constant 0 : i32
    %c0_i32_1 = arith.constant 0 : i32
    return %c0_i32, %c0_i32_0 : i32, i32
  }
  func.func @transform_2(%arg0: i32) -> (i32, i32) {
    %c0_i32 = arith.constant 0 : i32
    %c0_i32_0 = arith.constant 0 : i32
    %c0_i32_1 = arith.constant 0 : i32
    return %c0_i32, %c0_i32_0 : i32, i32
  }
  func.func @transform_3(%arg0: i32) -> (i32, i32) {
    %c0_i32 = arith.constant 0 : i32
    %c0_i32_0 = arith.constant 0 : i32
    %c0_i32_1 = arith.constant 0 : i32
    return %c0_i32, %c0_i32_0 : i32, i32
  }
  func.func @transform_4(%arg0: i32) -> (i32, i32) {
    %c0_i32 = arith.constant 0 : i32
    %c0_i32_0 = arith.constant 0 : i32
    return %arg0, %c0_i32 : i32, i32
  }
}

</mosaic_0001>

<bundles_post_ra>
// kernel: linear_block_forward.1
= control target key start
LH: loop header
LB: loop body
LE: loop exit
PB: predicated region body
PF: predicated region fallthrough
CT: control target
= control target key end

     0   :  { %v370_v1 = vmov 0.0   ;;  %vm371_vm0 = vmmov 0   ;;  %s455_s0 = inlined_call_operand.vmem [shape: bf16[8,128], index: 0, kind: input, shape index: {}]   ;;  %s456_s1 = inlined_call_operand.vmem [shape: bf16[128,128], index: 1, kind: input, shape index: {}]   ;;  %s457_s2 = inlined_call_operand.vmem [shape: bf16[128,128], index: 2, kind: input, shape index: {}]   ;;  %s458_s3 = inlined_call_operand.vmem [shape: f32[2,128], index: 3, kind: input, shape index: {}]   ;;  %s459_s4 = inlined_call_operand.hbm [shape: f32[8,128], index: 4, kind: output, shape index: {}]  }
   0x1   :  { %v332_v0 = vld [vmem:[%s456_s1 + $0x38] sm:$0xff]   ;;  %289 = vmatprep.subr.bf16.mxu0 %v370_v1  ;;  %309 = vmatprep.subr.bf16.mxu1 %v370_v1  ;;  %v333_v2 = vld [vmem:[%s456_s1 + $0x30] sm:$0xff]   ;;  %v334_v3 = vld [vmem:[%s456_s1 + $0x28] sm:$0xff]  }
   0x2   :  { %290 = vmatpush3.bf16.msra.mxu0 %v332_v0  ;;  %305 = vmatprep.mubr.msk.bf16.mxu0 %vm371_vm0, %v370_v1  ;;  %v340_v4 = vld [vmem:[%s457_s2 + $0x38] sm:$0xff]   ;;  %v335_v5 = vld [vmem:[%s456_s1 + $0x20] sm:$0xff]   ;;  %v341_v6 = vld [vmem:[%s457_s2 + $0x30] sm:$0xff]  }
   0x3   :  { %291 = vmatprep.subr.bf16.mxu0 %v370_v1  ;;  %325 = vmatprep.mubr.msk.bf16.mxu1 %vm371_vm0, %v370_v1  ;;  %v336_v7 = vld [vmem:[%s456_s1 + $0x18] sm:$0xff]   ;;  %v342_v8 = vld [vmem:[%s457_s2 + $0x28] sm:$0xff]  }
   0x4   :  { %310 = vmatpush3.bf16.msra.mxu1 %v340_v4 }
   0x5   :  { %311 = vmatprep.subr.bf16.mxu1 %v370_v1 }
   0x6   :  { %292 = vmatpush3.bf16.msra.mxu0 %v333_v2 }
   0x7   :  { %293 = vmatprep.subr.bf16.mxu0 %v370_v1 }
   0x8   :  { %312 = vmatpush3.bf16.msra.mxu1 %v341_v6 }
   0x9   :  { %313 = vmatprep.subr.bf16.mxu1 %v370_v1 }
   0xa   :  { %294 = vmatpush3.bf16.msra.mxu0 %v334_v3 }
   0xb   :  { %295 = vmatprep.subr.bf16.mxu0 %v370_v1 }
   0xe   :  { %296 = vmatpush3.bf16.msra.mxu0 %v335_v5 }
   0xf   :  { %297 = vmatprep.subr.bf16.mxu0 %v370_v1 }
  0x10   :  { %9 = vsyncpa [#allocation3], 0  ;;  %v337_v9 = vld [vmem:[%s456_s1 + $0x10] sm:$0xff]   ;;  %314 = vmatpush3.bf16.msra.mxu1 %v342_v8  ;;  %v343_v10 = vld [vmem:[%s457_s2 + $0x20] sm:$0xff]   ;;  %v37_v18 = vlaneseq }
  0x11   :  { %315 = vmatprep.subr.bf16.mxu1 %v370_v1  ;;  %v338_v11 = vld [vmem:[%s456_s1 + $0x8] sm:$0xff]   ;;  %v344_v12 = vld [vmem:[%s457_s2 + $0x18] sm:$0xff]   ;;  %v339_v13 = vld [vmem:[%s456_s1] sm:$0xff]  }
  0x12   :  { %298 = vmatpush3.bf16.msra.mxu0 %v336_v7  ;;  %v345_v14 = vld [vmem:[%s457_s2 + $0x10] sm:$0xff]   ;;  %v20_v15 = vld [vmem:[%s455_s0] sm:$0xf]  ;;  %v346_v16 = vld [vmem:[%s457_s2 + $0x8] sm:$0xff]   ;;  %v38_v19 = vshrl.u32 %v37_v18, 7  ;;  %s372_s0 = smov [#allocation2]  }
  0x13   :  { %299 = vmatprep.subr.bf16.mxu0 %v370_v1  ;;  %v347_v17 = vld [vmem:[%s457_s2] sm:$0xff]   ;;  %s247_s2 = sshll.u32 %s372_s0, 4  ;;  %s248_s2 = int_to_ptr.vmem [resolvable:$true] %s247_s2 }
  0x14   :  { %316 = vmatpush3.bf16.msra.mxu1 %v343_v10  ;;  %v39_v20 = vsub.s32 0, %v38_v19  ;;  %v19_v21 = vld [vmem:[%s458_s3] sm:$0x3]  ;;  %v149_v30 = vsub.s32 1, %v38_v19  ;;  %s348_s3 = scalar_lea.vmem %s248_s2, 128  ;;  %p353_p1 = scmp.lt.s32.totalorder %s248_s2, %s248_s2 }
  0x15   :  { %317 = vmatprep.subr.bf16.mxu1 %v370_v1  ;;  %p349_p0 = scmp.ne.s32.totalorder %s248_s2, %s348_s3  ;;  %p354_p2 = scmp.lt.s32.totalorder %s348_s3, %s348_s3 }
  0x16   :  { %300 = vmatpush3.bf16.msra.mxu0 %v337_v9  ;;  %v40_v22 = vrot.slane %v19_v21, %v39_v20  ;;  %v150_v31 = vrot.slane %v19_v21, %v149_v30 }
  0x17   :  { %301 = vmatprep.subr.bf16.mxu0 %v370_v1  ;;  %p355_p3 = por %p354_p2, %p353_p1 }
  0x18   :  { %318 = vmatpush3.bf16.msra.mxu1 %v344_v12 }
  0x19   :  { %319 = vmatprep.subr.bf16.mxu1 %v370_v1  ;;  %p356_p4 = pnand %p355_p3, %p349_p0 }
  0x1a   :  { %302 = vmatpush3.bf16.msra.mxu0 %v338_v11 }
  0x1b   :  { %303 = vmatprep.subr.bf16.mxu0 %v370_v1 }
  0x1c   :  { %320 = vmatpush3.bf16.msra.mxu1 %v345_v14 }
  0x1d   :  { %321 = vmatprep.subr.bf16.mxu1 %v370_v1 }
  0x1e   :  { %304 = vmatpush3.bf16.msra.mxu0 %v339_v13 }
  0x20   :  { %322 = vmatpush3.bf16.msra.mxu1 %v346_v16 }
  0x21   :  { %306 = vmatmul.mubr.bf16.vlgmr.msra.gmra.mxu0 %v20_v15  ;;  %323 = vmatprep.subr.bf16.mxu1 %v370_v1 }
  0x24   :  { %324 = vmatpush3.bf16.msra.mxu1 %v347_v17 }
  0xe1   :  { %v123_v23 = vpop.f32.mrf.mxu0 }
  0xe2   :  { %v124_v24 = vadd.f32 %v123_v23, %v40_v22 }
  0xe3   :  { %v307_v25 = vpop.f32.mrf.mxu0 }
  0xe4   :  { %v129_v26 = vmax.f32 %v124_v24, 0.0 }
  0xe5   :  { %v126_v27 = vpop.f32.mrf.mxu0 }
  0xe6   :  { %v130_v28 = vpack.c.bf16 %v129_v26, %v129_v26 }
  0xe7   :  { %v308_v29 = vpop.f32.mrf.mxu0 }
  0xe8   :  { %326 = vmatmul.mubr.bf16.vlgmr.msra.gmra.mxu1 %v130_v28 }
 0x1a8   :  { %v233_v32 = vpop.f32.mrf.mxu1 }
 0x1a9   :  { %v234_v33 = vadd.f32 %v233_v32, %v150_v31 }
 0x1aa   :  { %v327_v34 = vpop.f32.mrf.mxu1 }
 0x1ab   :  { %v239_v35 = vmax.f32 %v234_v33, 0.0 }
 0x1ac   :  { %v236_v36 = vpop.f32.mrf.mxu1 }
 0x1ad   :  { %240 = vst [vmem:[#allocation2] sm:$0xff] %v239_v35 }
 0x1ae   :  { %v328_v37 = vpop.f32.mrf.mxu1 }
 0x1af   :  { %359 = shalt.err (!%p356_p4)
}
 0x1b0   :  { %250 = dma.vmem_to_hbm [thread:$0]  %s248_s2, 128, %s459_s4, [#allocation3]  }
 0x1b1   :  { %368 = dma.done.wait [#allocation3], 128  }
 0x1b2   :  { %369 = vsyncadd [#allocation3], 4294967168 }
 0x1b3   :  { %254 = vsyncpa [#allocation3], 1 }

</bundles_post_ra>
